<compile_context>
chip_gen: v7x
topology: tpu7x:2x2x1
jax: 0.10.0
libtpu: 0.0.40
codegen_flags: <defaults>
</compile_context>

<pallas_src>
import functools

import numpy as np

import jax
import jax.numpy as jnp
from jax import lax
from jax.experimental import pallas as pl
from jax.experimental.pallas import tpu as pltpu


# ------------------------------- helpers ----------------------------------- #

def _round_up(x, m):
    return ((x + m - 1) // m) * m


def _vmem_limit_bytes(estimate):
    """Explicit scoped-VMEM request clamped to [32 MiB, 64 MiB].

    32 MiB >= the default scoped limit on every generation; 64 MiB stays within
    v7x's 64 MiB physical VMEM (v5e/v6e have 128 MiB, so this is safe there too).
    """
    return int(min(64 << 20, max(32 << 20, estimate)))


@functools.lru_cache(maxsize=1)
def _single_buffer_mode():
    """pl.Buffered(1) if this JAX/Pallas supports single-buffering constant-index
    blocks via BlockSpec(pipeline_mode=...); otherwise None (graceful fallback)."""
    try:
        try:
            mode = pl.Buffered(buffer_count=1)
        except TypeError:
            mode = pl.Buffered(1)

        def probe(x_ref, w_ref, o_ref):
            o_ref[...] = x_ref[...] + w_ref[...]

        fn = pl.pallas_call(
            probe,
            out_shape=jax.ShapeDtypeStruct((16, 256), jnp.float32),
            grid=(2, 2),
            in_specs=[
                pl.BlockSpec((8, 128), lambda i, j: (i, j)),
                pl.BlockSpec((8, 128), lambda i, j: (0, 0), pipeline_mode=mode),
            ],
            out_specs=pl.BlockSpec((8, 128), lambda i, j: (i, j)),
        )
        jax.block_until_ready(
            fn(jnp.ones((16, 256), jnp.float32), jnp.ones((8, 128), jnp.float32)))
        return mode
    except Exception:
        return None


def _const_spec(block_shape, index_map):
    """BlockSpec for a loop-invariant (constant index_map) operand.

    Single-buffered when supported: the default second pipeline buffer for a
    never-changing block is pure VMEM waste (decisive at realistic H on v7x)."""
    mode = _single_buffer_mode()
    if mode is None:
        return pl.BlockSpec(block_shape, index_map)
    return pl.BlockSpec(block_shape, index_map, pipeline_mode=mode)


def _build_bidir_recurrent_weights(params):
    """Block-diagonal recurrent weights with columns [r_f z_f n_f | r_b z_b n_b]
    and rows [h_f | h_b]: every gate of every direction is a contiguous slice of
    the single per-step matmul result (no per-step concatenates)."""
    wf, wb = params["whh_f_T"], params["whh_b_T"]          # (H, 3H) each
    H = wf.shape[0]
    z = jnp.zeros((H, 3 * H), jnp.float32)
    whh_bd = jnp.concatenate(
        [jnp.concatenate([wf, z], axis=1),
         jnp.concatenate([z, wb], axis=1)], axis=0)        # (2H, 6H)
    bhh = jnp.concatenate([params["bhh_f"], params["bhh_b"]])   # (6H,)
    return whh_bd, bhh


# ----------------------------- Pallas kernels ------------------------------ #

def _proj_kernel(x_ref, w1_ref, b1_ref, wcat_ref, bcat_ref, of_ref, ob_ref, *, h3):
    """Fused Linear+ReLU followed by BOTH GRU input-gate projections (one matmul)."""
    h = jnp.dot(x_ref[...], w1_ref[...], preferred_element_type=jnp.float32)
    h = jnp.maximum(h + b1_ref[...], 0.0)
    g = jnp.dot(h, wcat_ref[...], preferred_element_type=jnp.float32) + bcat_ref[...]
    of_ref[...] = g[:, :h3].astype(of_ref.dtype)           # forward gates  [r z n]
    ob_ref[...] = g[:, h3:].astype(ob_ref.dtype)           # backward gates [r z n]


def fused_input_projection(x, w_lin, b_lin, wih_cat, bih_cat, *, tm, xg_dtype):
    """x: (M, F) time-major flattened rows (M a multiple of tm).
    Returns xg_f, xg_b, each (M, 3H) in xg_dtype."""
    M, F = x.shape
    H = w_lin.shape[1]
    itemsize = np.dtype(xg_dtype).itemsize
    est = (2 * (tm * F * 4 + 2 * tm * 3 * H * itemsize)          # pipelined data blocks
           + 2 * (F * H + H + 6 * H * H + 6 * H) * 4)            # resident weights
    return pl.pallas_call(
        functools.partial(_proj_kernel, h3=3 * H),
        out_shape=(jax.ShapeDtypeStruct((M, 3 * H), xg_dtype),
                   jax.ShapeDtypeStruct((M, 3 * H), xg_dtype)),
        grid=(M // tm,),
        in_specs=[
            pl.BlockSpec((tm, F), lambda i: (i, 0)),
            _const_spec((F, H), lambda i: (0, 0)),
            _const_spec((1, H), lambda i: (0, 0)),
            _const_spec((H, 6 * H), lambda i: (0, 0)),
            _const_spec((1, 6 * H), lambda i: (0, 0)),
        ],
        out_specs=(pl.BlockSpec((tm, 3 * H), lambda i: (i, 0)),
                   pl.BlockSpec((tm, 3 * H), lambda i: (i, 0))),
        compiler_params=pltpu.CompilerParams(
            dimension_semantics=("parallel",),
            vmem_limit_bytes=_vmem_limit_bytes(2 * est)),
    )(x, w_lin, b_lin.reshape(1, -1), wih_cat, bih_cat.reshape(1, -1))


def _bigru_gpool_kernel(xgf_ref, xgb_ref, whh_ref, bhh_ref, wh_ref, bh_ref,
                        o_ref, h_scr, accf_scr, accb_scr, *,
                        hidden, chunk, true_t, pad_t):
    """One (batch-tile, time-chunk) grid step of the fused bi-GRU + gpool head.

    xgf_ref: (chunk, tn, 3H) forward gates for times  [c*chunk, (c+1)*chunk)
    xgb_ref: (chunk, tn, 3H) backward gates for times [T_pad-(c+1)*chunk, T_pad-c*chunk)
             (chunk order reversed via index_map; reversed again inside the loop).
    whh_ref: (2H, 6H) block-diagonal recurrent weights, cols [r_f z_f n_f | r_b z_b n_b].
    h_scr:   (tn, 2H) persistent hidden state [h_f | h_b].
    accf_scr/accb_scr: (tn, H) running time-sums per direction.
    """
    H = hidden
    c = pl.program_id(1)

    @pl.when(c == 0)
    def _():
        h_scr[...] = jnp.zeros_like(h_scr)
        accf_scr[...] = jnp.zeros_like(accf_scr)
        accb_scr[...] = jnp.zeros_like(accb_scr)

    def one_dir(xg, hgd, h_prev):
        r = jax.nn.sigmoid(xg[:, 0:H] + hgd[:, 0:H])
        z = jax.nn.sigmoid(xg[:, H:2 * H] + hgd[:, H:2 * H])
        n = jnp.tanh(xg[:, 2 * H:3 * H] + r * hgd[:, 2 * H:3 * H])
        return n + z * (h_prev - n)          # == (1-z)*n + z*h, one fewer VPU op

    def step(s, carry):
        h = h_scr[...]                                             # (tn, 2H) = [h_f | h_b]
        hg = jnp.dot(h, whh_ref[...],
                     preferred_element_type=jnp.float32) + bhh_ref[...]
        xf = xgf_ref[s].astype(jnp.float32)                        # time c*chunk + s
        xb = xgb_ref[chunk - 1 - s].astype(jnp.float32)            # time T_pad-1-(c*chunk+s)
        hf = one_dir(xf, hg[:, 0:3 * H], h[:, 0:H])
        hb = one_dir(xb, hg[:, 3 * H:6 * H], h[:, H:2 * H])
        if pad_t:  # static: emitted only when T was padded to a multiple of chunk
            g = c * chunk + s
            vf = g < true_t              # forward padding sits at the end of time
            vb = g >= pad_t              # backward direction consumes padding first
            accf_scr[...] += jnp.where(vf, hf, 0.0)
            accb_scr[...] += jnp.where(vb, hb, 0.0)
            h_scr[:, 0:H] = jnp.where(vf, hf, h[:, 0:H])
            h_scr[:, H:2 * H] = jnp.where(vb, hb, h[:, H:2 * H])
        else:
            accf_scr[...] += hf
            accb_scr[...] += hb
            h_scr[:, 0:H] = hf
            h_scr[:, H:2 * H] = hb
        return carry

    # Capped unroll keeps vreg pressure bounded when chunk is large.
    lax.fori_loop(0, chunk, step, 0, unroll=min(8, chunk))

    @pl.when(c == pl.num_programs(1) - 1)
    def _():
        pooled = jnp.concatenate([accf_scr[...], accb_scr[...]], axis=-1) * (1.0 / true_t)
        o_ref[...] = (jnp.dot(pooled, wh_ref[...], preferred_element_type=jnp.float32)
                      + bh_ref[...]).astype(o_ref.dtype)


def bigru_gpool_head(xg_f, xg_b, whh_bd, bhh, w_head, b_head, *, tt, tn, true_t, pad_t):
    """xg_f/xg_b: (T_pad, N_pad, 3H) time-major gates. Returns logits (N_pad, O)."""
    T_pad, N_pad, H3 = xg_f.shape
    H = H3 // 3
    O = w_head.shape[1]
    n_chunks = T_pad // tt
    nb = N_pad // tn

    xg_item = xg_f.dtype.itemsize
    est = (4 * tt * tn * H3 * xg_item                       # 2 inputs x 2 pipeline buffers
           + 2 * (2 * H * 6 * H + 6 * H + 2 * H * O + O) * 4
           + 4 * tn * H * 4                                  # scratch (h + two acc halves)
           + 2 * tn * O * 4)

    kernel = functools.partial(_bigru_gpool_kernel, hidden=H, chunk=tt,
                               true_t=true_t, pad_t=pad_t)
    return pl.pallas_call(
        kernel,
        out_shape=jax.ShapeDtypeStruct((N_pad, O), jnp.float32),
        grid=(nb, n_chunks),
        in_specs=[
            pl.BlockSpec((tt, tn, H3), lambda b, c: (c, b, 0)),
            pl.BlockSpec((tt, tn, H3), lambda b, c: (n_chunks - 1 - c, b, 0)),
            _const_spec((2 * H, 6 * H), lambda b, c: (0, 0)),
            _const_spec((1, 6 * H), lambda b, c: (0, 0)),
            _const_spec((2 * H, O), lambda b, c: (0, 0)),
            _const_spec((1, O), lambda b, c: (0, 0)),
        ],
        out_specs=pl.BlockSpec((tn, O), lambda b, c: (b, 0)),
        scratch_shapes=[pltpu.VMEM((tn, 2 * H), jnp.float32),   # hidden state [h_f | h_b]
                        pltpu.VMEM((tn, H), jnp.float32),       # running sum of h_f
                        pltpu.VMEM((tn, H), jnp.float32)],      # running sum of h_b
        compiler_params=pltpu.CompilerParams(
            dimension_semantics=("parallel", "arbitrary"),
            vmem_limit_bytes=_vmem_limit_bytes(2 * est)),
    )(xg_f, xg_b, whh_bd, bhh.reshape(1, -1), w_head, b_head.reshape(1, -1))


# ------------------------------ Full forward ------------------------------- #

def rnn_islr_forward(feature, params, *, row_tile=512, time_chunk=32, batch_tile=128,
                     xg_dtype=jnp.bfloat16):
    """feature: (N, C, T, J) float32. Returns logits (N, out_channels)."""
    N, C, T, J = feature.shape
    F = C * J
    H = params["w_lin_T"].shape[1]

    itemsize = np.dtype(xg_dtype).itemsize
    sub = 16 if itemsize == 2 else 8           # sublane multiple for the xg stream dtype

    # Pad batch / time up to aligned tiles (never shrink tiles to odd divisors);
    # padded timesteps are masked inside kernel 2, padded batch rows are sliced off.
    N_pad = _round_up(N, sub)
    tn = min(_round_up(max(batch_tile, sub), sub), N_pad)
    N_pad = _round_up(N_pad, tn)
    tt = max(1, min(time_chunk, T))
    n_chunks = -(-T // tt)
    T_pad = n_chunks * tt
    pad_t = T_pad - T
    if N_pad != N or T_pad != T:
        feature = jnp.pad(feature, ((0, N_pad - N), (0, 0), (0, T_pad - T), (0, 0)))

    # Single layout change on the raw input: (N,C,T,J) -> time-major rows (T*N, C*J).
    x_tm = jnp.transpose(feature, (2, 0, 1, 3)).reshape(T_pad * N_pad, F)
    M = T_pad * N_pad
    tm = min(_round_up(max(row_tile, sub), sub), M)
    M_pad = _round_up(M, tm)
    if M_pad != M:
        x_tm = jnp.pad(x_tm, ((0, M_pad - M), (0, 0)))

    # Kernel 1: fused Linear+ReLU + ONE concatenated input-gate matmul (bf16 xg stream).
    # Weights stay f32: they are small and resident; the HBM-traffic win is the xg stream.
    wih_cat = jnp.concatenate([params["wih_f_T"], params["wih_b_T"]], axis=1)   # (H, 6H)
    bih_cat = jnp.concatenate([params["bih_f"], params["bih_b"]])               # (6H,)
    xg_f, xg_b = fused_input_projection(
        x_tm, params["w_lin_T"], params["b_lin"], wih_cat, bih_cat,
        tm=tm, xg_dtype=xg_dtype)
    if M_pad != M:
        xg_f = xg_f[:M]
        xg_b = xg_b[:M]
    xg_f = xg_f.reshape(T_pad, N_pad, 3 * H)
    xg_b = xg_b.reshape(T_pad, N_pad, 3 * H)

    # Kernel 2: fused bidirectional GRU + gpool head (hidden sequence never hits HBM).
    # TODO(synk): TemporalAttention definition is not provided -> identity pass-through.
    # TODO(synk): feature_pad_mask / pack_padded_sequence path not implemented (mask=None).
    whh_bd, bhh = _build_bidir_recurrent_weights(params)
    logits = bigru_gpool_head(xg_f, xg_b, whh_bd, bhh,
                              params["w_head_T"], params["b_head"],
                              tt=tt, tn=tn, true_t=T, pad_t=pad_t)
    return logits[:N]


# --------------------------- Pure-JAX reference ----------------------------- #

def _gru_ref(x_btf, wih, whh, bih, bhh):
    H = whh.shape[1]
    Nb = x_btf.shape[0]

    def step(hh, xt):
        xg = xt @ wih.T + bih
        hg = hh @ whh.T + bhh
        r = jax.nn.sigmoid(xg[:, :H] + hg[:, :H])
        z = jax.nn.sigmoid(xg[:, H:2 * H] + hg[:, H:2 * H])
        n = jnp.tanh(xg[:, 2 * H:] + r * hg[:, 2 * H:])
        h_new = (1.0 - z) * n + z * hh
        return h_new, h_new

    h0 = jnp.zeros((Nb, H), jnp.float32)
    _, seq = lax.scan(step, h0, jnp.swapaxes(x_btf, 0, 1))
    return jnp.swapaxes(seq, 0, 1)


def rnn_islr_reference(feature, params):
    N, C, T, J = feature.shape
    x = jnp.transpose(feature, (0, 2, 1, 3)).reshape(N, T, C * J)
    h = jnp.maximum(x @ params["w_lin_T"] + params["b_lin"], 0.0)
    seq_f = _gru_ref(h, params["wih_f_T"].T, params["whh_f_T"].T,
                     params["bih_f"], params["bhh_f"])
    seq_b = _gru_ref(h[:, ::-1], params["wih_b_T"].T, params["whh_b_T"].T,
                     params["bih_b"], params["bhh_b"])[:, ::-1]
    hs = jnp.concatenate([seq_f, seq_b], axis=-1)             # (N, T, 2H)
    pooled = hs.mean(axis=1)
    return pooled @ params["w_head_T"] + params["b_head"]


# ------------------------------- Param setup -------------------------------- #

def init_params(key, in_feats, hidden, out_channels):
    ks = jax.random.split(key, 16)
    u = lambda k, shape, bound: jax.random.uniform(k, shape, jnp.float32, -bound, bound)
    b_lin = 1.0 / jnp.sqrt(in_feats)
    b_gru = 1.0 / jnp.sqrt(hidden)
    b_head = 1.0 / jnp.sqrt(2 * hidden)
    return {
        # nn.Linear(in_feats, hidden): weight (hidden, in_feats) stored transposed.
        "w_lin_T": u(ks[0], (in_feats, hidden), b_lin),
        "b_lin":   u(ks[1], (hidden,), b_lin),
        # GRU forward direction (weight_ih / weight_hh are (3H, H), stored transposed).
        "wih_f_T": u(ks[2], (hidden, 3 * hidden), b_gru),
        "whh_f_T": u(ks[3], (hidden, 3 * hidden), b_gru),
        "bih_f":   u(ks[4], (3 * hidden,), b_gru),
        "bhh_f":   u(ks[5], (3 * hidden,), b_gru),
        # GRU backward direction.
        "wih_b_T": u(ks[6], (hidden, 3 * hidden), b_gru),
        "whh_b_T": u(ks[7], (hidden, 3 * hidden), b_gru),
        "bih_b":   u(ks[8], (3 * hidden,), b_gru),
        "bhh_b":   u(ks[9], (3 * hidden,), b_gru),
        # GPoolRecognitionHead linear (2H -> out), transposed.
        "w_head_T": u(ks[10], (2 * hidden, out_channels), b_head),
        "b_head":   u(ks[11], (out_channels,), b_head),
    }


# ---------------------------------- Main ------------------------------------ #

if __name__ == "__main__":
    key = jax.random.PRNGKey(0)
    k_feat1, k_feat2, k_par = jax.random.split(key, 3)

    hidden, out_channels = 32, 16
    C, J = 4, 4                                   # in_channels = C*J = 16
    params = init_params(k_par, C * J, hidden, out_channels)

    # Case 1: small, evenly tiled demo shapes (N=2, C=4, T=16, J=4).
    feat1 = jax.random.normal(k_feat1, (2, C, 16, J), jnp.float32)
    out1 = jax.block_until_ready(
        rnn_islr_forward(feat1, params, row_tile=32, time_chunk=8, batch_tile=16))
    ref1 = rnn_islr_reference(feat1, params)
    assert out1.shape == (2, out_channels)
    assert jnp.allclose(out1, ref1, atol=2e-2, rtol=2e-2), "case-1 mismatch vs JAX reference"

    # Case 2: ragged T and more than one batch tile -> exercises the time-mask
    # path, the parallel batch axis, and per-tile state re-initialization.
    feat2 = jax.random.normal(k_feat2, (18, C, 13, J), jnp.float32)
    out2 = jax.block_until_ready(
        rnn_islr_forward(feat2, params, row_tile=64, time_chunk=8, batch_tile=16))
    ref2 = rnn_islr_reference(feat2, params)
    assert out2.shape == (18, out_channels)
    assert jnp.allclose(out2, ref2, atol=2e-2, rtol=2e-2), "case-2 mismatch vs JAX reference"

    print("KERNEL_OK")
</pallas_src>

<mosaic_0001>
module attributes {stable_mosaic.version = 11 : i64} {
  func.func @probe(%arg0: i32, %arg1: i32, %arg2: memref<8x128xf32, #tpu.memory_space<vmem>>, %arg3: memref<8x128xf32, #tpu.memory_space<vmem>>, %arg4: memref<8x128xf32, #tpu.memory_space<vmem>>) attributes {dimension_semantics = [#tpu.dimension_semantics<arbitrary>, #tpu.dimension_semantics<arbitrary>], iteration_bounds = array<i64: 2, 2>, scalar_prefetch = 0 : i64, scratch_operands = 0 : i64, tpu.core_type = #tpu.core_type<tc>, window_params = [{transform_indices = @transform_0, window_bounds = array<i64: 8, 128>}, {pipeline_mode = #tpu.pipeline_mode<synchronous>, transform_indices = @transform_1, window_bounds = array<i64: 8, 128>}, {transform_indices = @transform_2, window_bounds = array<i64: 8, 128>}]} {
    %c0 = arith.constant 0 : index
    %c0_0 = arith.constant 0 : index
    %0 = vector.load %arg2[%c0, %c0_0] : memref<8x128xf32, #tpu.memory_space<vmem>>, vector<8x128xf32>
    %c0_1 = arith.constant 0 : index
    %c0_2 = arith.constant 0 : index
    %1 = vector.load %arg3[%c0_1, %c0_2] : memref<8x128xf32, #tpu.memory_space<vmem>>, vector<8x128xf32>
    %2 = arith.addf %0, %1 : vector<8x128xf32>
    %c0_3 = arith.constant 0 : index
    %c0_4 = arith.constant 0 : index
    %3 = vector.load %arg4[%c0_3, %c0_4] : memref<8x128xf32, #tpu.memory_space<vmem>>, vector<8x128xf32>
    tpu.vector_store %arg4[%c0_3, %c0_4], %2 {strides = array<i32>} : memref<8x128xf32, #tpu.memory_space<vmem>>, vector<8x128xf32>,
    return
  }
  func.func @transform_0(%arg0: i32, %arg1: i32) -> (i32, i32) {
    %c0_i32 = arith.constant 0 : i32
    return %arg0, %arg1 : i32, i32
  }
  func.func @transform_1(%arg0: i32, %arg1: i32) -> (i32, i32) {
    %c0_i32 = arith.constant 0 : i32
    %c0_i32_0 = arith.constant 0 : i32
    %c0_i32_1 = arith.constant 0 : i32
    return %c0_i32, %c0_i32_0 : i32, i32
  }
  func.func @transform_2(%arg0: i32, %arg1: i32) -> (i32, i32) {
    %c0_i32 = arith.constant 0 : i32
    return %arg0, %arg1 : i32, i32
  }
}

module attributes {stable_mosaic.version = 11 : i64} {
  func.func @_proj_kernel(%arg0: i32, %arg1: memref<32x16xf32, #tpu.memory_space<vmem>>, %arg2: memref<16x32xf32, #tpu.memory_space<vmem>>, %arg3: memref<1x32xf32, #tpu.memory_space<vmem>>, %arg4: memref<32x192xf32, #tpu.memory_space<vmem>>, %arg5: memref<1x192xf32, #tpu.memory_space<vmem>>, %arg6: memref<32x96xbf16, #tpu.memory_space<vmem>>, %arg7: memref<32x96xbf16, #tpu.memory_space<vmem>>) attributes {dimension_semantics = [#tpu.dimension_semantics<parallel>], iteration_bounds = array<i64: 8>, scalar_prefetch = 0 : i64, scratch_operands = 0 : i64, tpu.core_type = #tpu.core_type<tc>, window_params = [{transform_indices = @transform_0, window_bounds = array<i64: 32, 16>}, {pipeline_mode = #tpu.pipeline_mode<synchronous>, transform_indices = @transform_1, window_bounds = array<i64: 16, 32>}, {pipeline_mode = #tpu.pipeline_mode<synchronous>, transform_indices = @transform_2, window_bounds = array<i64: 1, 32>}, {pipeline_mode = #tpu.pipeline_mode<synchronous>, transform_indices = @transform_3, window_bounds = array<i64: 32, 192>}, {pipeline_mode = #tpu.pipeline_mode<synchronous>, transform_indices = @transform_4, window_bounds = array<i64: 1, 192>}, {transform_indices = @transform_5, window_bounds = array<i64: 32, 96>}, {transform_indices = @transform_6, window_bounds = array<i64: 32, 96>}]} {
    %c0 = arith.constant 0 : index
    %c0_0 = arith.constant 0 : index
    %0 = vector.load %arg1[%c0, %c0_0] : memref<32x16xf32, #tpu.memory_space<vmem>>, vector<32x16xf32>
    %c0_1 = arith.constant 0 : index
    %c0_2 = arith.constant 0 : index
    %1 = vector.load %arg2[%c0_1, %c0_2] : memref<16x32xf32, #tpu.memory_space<vmem>>, vector<16x32xf32>
    %cst = arith.constant dense<0.000000e+00> : vector<32x32xf32>
    %2 = tpu.matmul %0, %1, %cst {dimension_numbers = #tpu.dot_dimension_numbers<[1], [0], [0], [1], [0, 0, 1, 1], [], []>} : vector<32x16xf32>, vector<16x32xf32>, vector<32x32xf32> -> vector<32x32xf32>
    %c0_3 = arith.constant 0 : index
    %c0_4 = arith.constant 0 : index
    %3 = vector.load %arg3[%c0_3, %c0_4] : memref<1x32xf32, #tpu.memory_space<vmem>>, vector<1x32xf32>
    %4 = vector.broadcast %3 : vector<1x32xf32> to vector<32x32xf32>
    %5 = arith.addf %2, %4 : vector<32x32xf32>
    %cst_5 = arith.constant 0.000000e+00 : f32
    %6 = vector.broadcast %cst_5 : f32 to vector<32x32xf32>
    %7 = arith.maximumf %5, %6 : vector<32x32xf32>
    %c0_6 = arith.constant 0 : index
    %c0_7 = arith.constant 0 : index
    %8 = vector.load %arg4[%c0_6, %c0_7] : memref<32x192xf32, #tpu.memory_space<vmem>>, vector<32x192xf32>
    %cst_8 = arith.constant dense<0.000000e+00> : vector<32x192xf32>
    %9 = tpu.matmul %7, %8, %cst_8 {dimension_numbers = #tpu.dot_dimension_numbers<[1], [0], [0], [1], [0, 0, 1, 1], [], []>} : vector<32x32xf32>, vector<32x192xf32>, vector<32x192xf32> -> vector<32x192xf32>
    %c0_9 = arith.constant 0 : index
    %c0_10 = arith.constant 0 : index
    %10 = vector.load %arg5[%c0_9, %c0_10] : memref<1x192xf32, #tpu.memory_space<vmem>>, vector<1x192xf32>
    %11 = vector.broadcast %10 : vector<1x192xf32> to vector<32x192xf32>
    %12 = arith.addf %9, %11 : vector<32x192xf32>
    %13 = vector.extract_strided_slice %12 {offsets = [0, 0], sizes = [32, 96], strides = [1, 1]} : vector<32x192xf32> to vector<32x96xf32>
    %14 = arith.truncf %13 : vector<32x96xf32> to vector<32x96xbf16>
    %c0_11 = arith.constant 0 : index
    %c0_12 = arith.constant 0 : index
    %15 = vector.load %arg6[%c0_11, %c0_12] : memref<32x96xbf16, #tpu.memory_space<vmem>>, vector<32x96xbf16>
    tpu.vector_store %arg6[%c0_11, %c0_12], %14 {strides = array<i32>} : memref<32x96xbf16, #tpu.memory_space<vmem>>, vector<32x96xbf16>,
    %16 = vector.extract_strided_slice %12 {offsets = [0, 96], sizes = [32, 96], strides = [1, 1]} : vector<32x192xf32> to vector<32x96xf32>
    %17 = arith.truncf %16 : vector<32x96xf32> to vector<32x96xbf16>
    %c0_13 = arith.constant 0 : index
    %c0_14 = arith.constant 0 : index
    %18 = vector.load %arg7[%c0_13, %c0_14] : memref<32x96xbf16, #tpu.memory_space<vmem>>, vector<32x96xbf16>
    tpu.vector_store %arg7[%c0_13, %c0_14], %17 {strides = array<i32>} : memref<32x96xbf16, #tpu.memory_space<vmem>>, vector<32x96xbf16>,
    return
  }
  func.func @transform_0(%arg0: i32) -> (i32, i32) {
    %c0_i32 = arith.constant 0 : i32
    %c0_i32_0 = arith.constant 0 : i32
    return %arg0, %c0_i32 : i32, i32
  }
  func.func @transform_1(%arg0: i32) -> (i32, i32) {
    %c0_i32 = arith.constant 0 : i32
    %c0_i32_0 = arith.constant 0 : i32
    %c0_i32_1 = arith.constant 0 : i32
    return %c0_i32, %c0_i32_0 : i32, i32
  }
  func.func @transform_2(%arg0: i32) -> (i32, i32) {
    %c0_i32 = arith.constant 0 : i32
    %c0_i32_0 = arith.constant 0 : i32
    %c0_i32_1 = arith.constant 0 : i32
    return %c0_i32, %c0_i32_0 : i32, i32
  }
  func.func @transform_3(%arg0: i32) -> (i32, i32) {
    %c0_i32 = arith.constant 0 : i32
    %c0_i32_0 = arith.constant 0 : i32
    %c0_i32_1 = arith.constant 0 : i32
    return %c0_i32, %c0_i32_0 : i32, i32
  }
  func.func @transform_4(%arg0: i32) -> (i32, i32) {
    %c0_i32 = arith.constant 0 : i32
    %c0_i32_0 = arith.constant 0 : i32
    %c0_i32_1 = arith.constant 0 : i32
    return %c0_i32, %c0_i32_0 : i32, i32
  }
  func.func @transform_5(%arg0: i32) -> (i32, i32) {
    %c0_i32 = arith.constant 0 : i32
    %c0_i32_0 = arith.constant 0 : i32
    return %arg0, %c0_i32 : i32, i32
  }
  func.func @transform_6(%arg0: i32) -> (i32, i32) {
    %c0_i32 = arith.constant 0 : i32
    %c0_i32_0 = arith.constant 0 : i32
    return %arg0, %c0_i32 : i32, i32
  }
}

</mosaic_0001>

<bundles_post_ra>
// kernel: tpu_custom_call.1
= control target key start
LH: loop header
LB: loop body
LE: loop exit
PB: predicated region body
PF: predicated region fallthrough
CT: control target
= control target key end

     0   :  { %s829_s0 = inlined_call_operand.hbm [shape: f32[16,256], index: 0, kind: input, shape index: {}]   ;;  %s830_s1 = inlined_call_operand.hbm [shape: f32[8,128], index: 1, kind: input, shape index: {}]   ;;  %s831_s2 = inlined_call_operand.hbm [shape: f32[16,256], index: 2, kind: output, shape index: {}]  }
   0x1   :  { %838 = sst [smem:[#allocation13_spill]] %s830_s1 }
   0x2   :  { %7 = vsyncpa [#allocation3], 0 }
   0x3   :  { %9 = vsyncpa [#allocation3 + $0x1], 0 }
   0x4   :  { %10 = vsyncpa [#allocation6], 0 }
   0x5   :  { %11 = vsyncpa [#allocation4], 0 }
   0x6   :  { %13 = vsyncpa [#allocation4 + $0x1], 0  ;;  %s591_s9 = smov 0   ;;  %s593_s10 = smov 0  }
   0x7   :  { %s595_s11 = smov 0   ;;  %s597_s12 = smov 0  }
   0x8   :  { %s599_s13 = smov 0   ;;  %s601_s14 = smov 0  }
   0x9   :  { %s603_s15 = smov 0   ;;  %s605_s16 = smov 0  }
   0xa LB: > { %s305_s17 = sadd.s32 4294967295, %s571_s16   ;;  %s306_s18 = sadd.s32 4294967294, %s571_s16   ;;  %s571_s16 = sphi %s605_s16, %s19_s16   ;;  %s567_s15 = sphi %s603_s15, %s864_s15   ;;  %s563_s14 = sphi %s601_s14, %s863_s14   ;;  %s559_s13 = sphi %s599_s13, %s862_s13   ;;  %s555_s12 = sphi %s597_s12, %s861_s12   ;;  %s551_s11 = sphi %s595_s11, %s860_s11   ;;  %s547_s10 = sphi %s593_s10, %s859_s10   ;;  %s543_s9 = sphi %s591_s9, %s858_s9  }
   0xb   : > { %p53_p0 = scmp.ne.s32.totalorder %s547_s10, %s543_s9  ;;  %p635_p1 = scmp.eq.s32.totalorder %s305_s17, 0 }
   0xc   : > { %p639_p2 = scmp.eq.s32.totalorder %s305_s17, 3  ;;  %p106_p3 = scmp.eq.s32.totalorder %s306_s18, 3 }
   0xd   : > { %s839_s19 = scalar_select %p635_p1, 1, 0 }
   0xe   : > { %s840_s20 = scalar_select %p639_p2, 1, 0 }
   0xf   : > { %p645_p4 = por %p635_p1, %p53_p0  ;;  %p307_p5 = scmp.ge.s32.totalorder %s571_s16, 1 }
  0x10   : > { %p650_p6 = por %p106_p3, %p53_p0  ;;  %p113_p7 = scmp.lt.s32.totalorder %s571_s16, 5 }
  0x11   : > { %s841_s21 = scalar_select %p645_p4, 1, 0 }
  0x12   : > { %s842_s22 = scalar_select %p650_p6, 1, 0 }
  0x13   : > { %p655_p8 = pnand %p307_p5, %p113_p7  ;;  %s573_s24 = smov [#allocation5]  }
  0x14   : > { %843 = sst [smem:[#allocation11_spill]] %s842_s22  ;;  %s126_s25 = sshll.u32 %s573_s24, 4  ;;  %s127_s25 = int_to_ptr.vmem [resolvable:$true] %s126_s25 }
  0x15   : > { %s844_s23 = scalar_select %p655_p8, 1, 0 }
  0x16   : > { %p330_p9 = pneg %p655_p8  ;;  %s28_s27 = sadd.s32 1, %s563_s14 }
  0x17   : > { %s846_s1 = sld [smem:[#allocation13_spill]] }
  0x18   : > { %p663_p10 = pnand %p330_p9, %p635_p1 }
  0x1a   : > { %p413_p12 = pneg %p663_p10 }
  0x1d   : > { %s411_s30 = scalar_lea.hbm %s846_s1, 128 }
  0x1e   : > { %p412_p11 = scmp.ne.s32.totalorder %s846_s1, %s411_s30  ;;  %p418_p3 = scmp.lt.u32.totalorder %s411_s30, %s846_s1 }
  0x20   : > { %p414_p13 = pnand %p413_p12, %p412_p11 }
  0x22   : > { %p415_p0 = pneg %p414_p13 }
  0x24   : > { %p420_p5 = pnand %p418_p3, %p415_p0 }
  0x26   : > { %423 = shalt.err (!%p420_p5)
}
  0x27   : > { %s424_s7 = scalar_lea.vmem %s127_s25, 128  ;;  %p432_p1 = scmp.lt.s32.totalorder %s127_s25, %s127_s25 }
  0x28   : > { %p425_p7 = scmp.ne.s32.totalorder %s127_s25, %s424_s7  ;;  %p433_p4 = scmp.lt.s32.totalorder %s424_s7, %s424_s7 }
  0x2a   : > { %p427_p9 = pnand %p425_p7, %p413_p12  ;;  %p434_p8 = por %p433_p4, %p432_p1 }
  0x2c   : > { %p428_p6 = pneg %p427_p9 }
  0x2e   : > { %p435_p2 = pnand %p434_p8, %p428_p6 }
  0x30   : > { %438 = shalt.err (!%p435_p2)
}
  0x31   : > { %333 = dma.hbm_to_vmem [thread:$0]  (!%p663_p10), %s846_s1, 128, %s127_s25, [#allocation6]  }
  0x32   : > { %p29_p1 = scmp.ge.s32.totalorder %s28_s27, 2  ;;  %s31_s18 = sadd.s32 1, %s567_s15 }
  0x33   : > { %s40_s24 = sadd.s32 1, %s551_s11  ;;  %p47_p2 = scmp.ne.s32.totalorder %s551_s11, %s547_s10 }
  0x34   : > { %s866_s27 = smov (%p29_p1, %s28_s27), 0  ;;  %s868_s18 = smov (!%p29_p1, %s31_s18), %s567_s15 }
  0x35   : > { %847 = sst [smem:[#allocation12_spill]] %s866_s27  ;;  %s36_s26 = ssub.s32 %s563_s14, %s866_s27 }
  0x36   : > { %p48_p4 = scmp.eq.s32.totalorder %s571_s16, 0  ;;  %p33_p6 = scmp.ge.s32.totalorder %s868_s18, 2 }
  0x37   : > { %p848_p8 = scmp.ne.s32.totalorder %s840_s20, 0  ;;  %p343_p12 = scmp.lt.s32.totalorder %s571_s16, 4 }
  0x38   : > { %p700_p10 = por %p48_p4, %p47_p2  ;;  %s870_s18 = smov (%p33_p6, %s868_s18), 0 }
  0x39   : > { %p696_p11 = por %p848_p8, %p47_p2  ;;  %s137_s29 = sand.u32 1, %s551_s11  }
  0x3a   : > { %s311_s30 = sshll.u32 %s567_s15, 1  ;;  %s35_s3 = ssub.s32 %s567_s15, %s870_s18 }
  0x3b   : > { %s37_s4 = sor.u32 %s36_s26, %s35_s3  ;;  %s310_s5 = sshll.u32 %s137_s29, 3 }
  0x3c   : > { %p38_p13 = scmp.eq.s32.totalorder %s37_s4, 0  ;;  %s146_s20 = sadd.s32 %s563_s14, %s311_s30 }
  0x3d   : > { %s141_s6 = scalar_lea.vmem [#allocation2], %s310_s5  ;;  %s312_s17 = sshll.u32 %s146_s20, 7 }
  0x3e   : > { %s150_s7 = sshll.u32 %s141_s6, 4  ;;  %s720_s22 = scalar_lea.hbm %s829_s0, %s312_s17  ;;  %s715_s7 = int_to_ptr.vmem [resolvable:$true] %s150_s7 }
  0x3f   : > { %s713_s8 = scalar_select %p38_p13, %s551_s11, %s40_s24  }
  0x40   : > { %p726_p0 = pnand %p343_p12, %p700_p10  ;;  %s138_s24 = scalar_lea.sflag [#allocation3], %s137_s29 }
  0x41   : > { %s439_s30 = scalar_lea.hbm %s720_s22, 128  ;;  %s444_s25 = scalar_lea.hbm %s829_s0, 512 }
  0x42   : > { %p440_p3 = scmp.ne.s32.totalorder %s720_s22, %s439_s30  ;;  %p441_p5 = pneg %p726_p0 }
  0x43   : > { %p445_p1 = scmp.lt.u32.totalorder %s720_s22, %s829_s0  ;;  %p446_p2 = scmp.lt.u32.totalorder %s444_s25, %s439_s30 }
  0x44   : > { %p442_p7 = pnand %p441_p5, %p440_p3  ;;  %p448_p6 = scmp.lt.u32.totalorder %s439_s30, %s720_s22 }
  0x45   : > { %p447_p4 = por %p446_p2, %p445_p1 }
  0x46   : > { %p443_p9 = pneg %p442_p7 }
  0x47   : > { %p449_p8 = por %p448_p6, %p447_p4 }
  0x49   : > { %p450_p10 = pnand %p449_p8, %p443_p9 }
  0x4b   : > { %453 = shalt.err (!%p450_p10)
}
  0x4c   : > { %s454_s29 = scalar_lea.vmem %s715_s7, 128  ;;  %s574_s5 = smov [#allocation2]  }
  0x4d   : > { %p455_p12 = scmp.ne.s32.totalorder %s715_s7, %s454_s29  ;;  %s459_s20 = sshll.u32 %s574_s5, 4  ;;  %s460_s20 = int_to_ptr.vmem [resolvable:$false] %s459_s20 }
  0x4e   : > { %s461_s6 = scalar_lea.vmem %s460_s20, 256  ;;  %p462_p7 = scmp.lt.s32.totalorder %s715_s7, %s460_s20 }
  0x4f   : > { %p457_p13 = pnand %p455_p12, %p441_p5  ;;  %p463_p1 = scmp.lt.s32.totalorder %s461_s6, %s454_s29 }
  0x51   : > { %p458_p3 = pneg %p457_p13  ;;  %p464_p2 = por %p463_p1, %p462_p7 }
  0x53   : > { %p465_p4 = pnand %p464_p2, %p458_p3 }
  0x55   : > { %468 = shalt.err (!%p465_p4)
}
  0x56   : > { %337 = dma.hbm_to_vmem [thread:$0]  (!%p726_p0), %s720_s22, 128, %s715_s7, %s138_s24  }
  0x57   : > { %p852_p9 = scmp.ne.s32.totalorder %s844_s23, 0 }
  0x58   : > { %s758_s17 = sand.u32 (!%p852_p9), 1, %s547_s10   ;;  %p853_p5 = scmp.ne.s32.totalorder (!%p852_p9), %s841_s21, 0 }
  0x59   : > { %159 = sbr.rel (%p852_p9) target bundleno = 126 (0x7e), region = 28  ;;  %s314_s30 = sshll.u32 (!%p852_p9), %s758_s17, 3 }
  0x5a   : > { %s162_s1 = scalar_lea.sflag (!%p852_p9), [#allocation3], %s758_s17  ;;  %s165_s27 = scalar_lea.vmem (!%p852_p9), [#allocation2], %s314_s30 }
  0x60   : > { %530 = dma.done.wait (%p853_p5), %s162_s1, 128  }
  0x61   : > { %532 = vsyncadd (%p853_p5), %s162_s1, 4294967168  ;;  %p854_p6 = scmp.ne.s32.totalorder %s839_s19, 0 }
  0x63   : > { %534 = dma.done.wait (%p854_p6), [#allocation6], 128  }
  0x64   : > { %536 = vsyncadd (%p854_p6), [#allocation6], 4294967168  ;;  %s318_s22 = sshll.u32 %s559_s13, 1  ;;  %s189_s7 = scalar_lea.vmem [#allocation7], %s314_s30  ;;  %v190_v0 = vld [vmem:[%s165_s27] sm:$0xff]  ;;  %v191_v1 = vld [vmem:[#allocation5] sm:$0xff] }
  0x65   : > { %s206_s23 = sadd.s32 %s555_s12, %s318_s22  ;;  %s210_s26 = sshll.u32 %s189_s7, 4  ;;  %v192_v2 = vadd.f32 %v191_v1, %v190_v0  ;;  %s772_s26 = int_to_ptr.vmem [resolvable:$true] %s210_s26 }
  0x66   : > { %s319_s24 = sshll.u32 %s206_s23, 7  ;;  %s195_s3 = scalar_lea.sflag [#allocation4], %s758_s17 }
  0x67   : > { %s777_s19 = scalar_lea.hbm %s831_s2, %s319_s24  ;;  %193 = vst [vmem:[%s189_s7] sm:$0xff] %v192_v2  ;;  %s469_s13 = scalar_lea.vmem %s772_s26, 128 }
  0x68   : > { %p470_p0 = scmp.ne.s32.totalorder %s772_s26, %s469_s13  ;;  %s575_s12 = smov [#allocation7]  }
  0x69   : > { %s473_s4 = sshll.u32 %s575_s12, 4  ;;  %s474_s4 = int_to_ptr.vmem [resolvable:$false] %s473_s4 }
  0x6a   : > { %p471_p8 = pnand %p470_p0, %p696_p11  ;;  %s475_s29 = scalar_lea.vmem %s474_s4, 256 }
  0x6b   : > { %p476_p12 = scmp.lt.s32.totalorder %s772_s26, %s474_s4  ;;  %p477_p13 = scmp.lt.s32.totalorder %s475_s29, %s469_s13 }
  0x6c   : > { %p472_p10 = pneg %p471_p8 }
  0x6d   : > { %p478_p3 = por %p477_p13, %p476_p12 }
  0x6f   : > { %p479_p7 = pnand %p478_p3, %p472_p10 }
  0x71   : > { %482 = shalt.err (!%p479_p7)
}
  0x72   : > { %s483_s5 = scalar_lea.hbm %s777_s19, 128  ;;  %s487_s17 = scalar_lea.hbm %s831_s2, 512 }
  0x73   : > { %p484_p1 = scmp.ne.s32.totalorder %s777_s19, %s483_s5  ;;  %p488_p9 = scmp.lt.u32.totalorder %s777_s19, %s831_s2 }
  0x74   : > { %p489_p5 = scmp.lt.u32.totalorder %s487_s17, %s483_s5  ;;  %p491_p0 = scmp.lt.u32.totalorder %s483_s5, %s777_s19 }
  0x75   : > { %p485_p2 = pnand %p484_p1, %p696_p11 }
  0x76   : > { %p490_p6 = por %p489_p5, %p488_p9 }
  0x77   : > { %p486_p4 = pneg %p485_p2 }
  0x78   : > { %p492_p8 = por %p491_p0, %p490_p6 }
  0x7a   : > { %p493_p10 = pnand %p492_p8, %p486_p4 }
  0x7c   : > { %496 = shalt.err (!%p493_p10)
}
  0x7d   : > { %328 = dma.vmem_to_hbm [thread:$0]  (%p696_p11), %s772_s26, 128, %s777_s19, %s195_s3  }
  0x7e PF: > { %s855_s27 = sld [smem:[#allocation11_spill]]  ;;  %p345_p12 = scmp.ge.s32.totalorder %s571_s16, 2 }
  0x7f   : > { %s222_s22 = sand.u32 1, %s543_s9  }
  0x80   : > { %s223_s23 = scalar_lea.sflag [#allocation4], %s222_s22 }
  0x84   : > { %p856_p13 = scmp.ne.s32.totalorder %s855_s27, 0 }
  0x86   : > { %p339_p3 = pnand %p345_p12, %p856_p13 }
  0x88   : > { %538 = dma.done.wait (!%p339_p3), %s223_s23, 128  }
  0x89   : > { %540 = vsyncadd (!%p339_p3), %s223_s23, 4294967168  ;;  %s19_s16 = sadd.s32 1, %s571_s16   ;;  %s857_s28 = sld [smem:[#allocation12_spill]] }
  0x8a   : > { %p16_p7 = scmp.ge.s32.totalorder %s19_s16, 6   ;;  %s858_s9 = smov %s547_s10 }
  0x8b   : > { %s859_s10 = smov %s551_s11  ;;  %s860_s11 = smov %s713_s8 }
  0x8c   : > { %s861_s12 = smov %s563_s14  ;;  %s862_s13 = smov %s567_s15 }
  0x8d   : > { %s864_s15 = smov %s870_s18  ;;  %18 = sbr.rel (!%p16_p7) target bundleno = 10 (0xa), region = 77 }
  0x8f   : > { %s863_s14 = smov %s857_s28 }
  0x94   :  { %228 = vsyncpa [#allocation3], 1 }
  0x95   :  { %230 = vsyncpa [#allocation3 + $0x1], 1 }
  0x96   :  { %231 = vsyncpa [#allocation6], 1 }
  0x97   :  { %232 = vsyncpa [#allocation4], 1 }
  0x98   :  { %234 = vsyncpa [#allocation4 + $0x1], 1 }

// kernel: tpu_custom_call.1
= control target key start
LH: loop header
LB: loop body
LE: loop exit
PB: predicated region body
PF: predicated region fallthrough
CT: control target
= control target key end

     0   :  { %s779_s21 = smov 0   ;;  %s859_s0 = inlined_call_operand.vmem [shape: f32[256,16], index: 0, kind: input, shape index: {}]   ;;  %s860_s1 = inlined_call_operand.vmem [shape: f32[16,32], index: 1, kind: input, shape index: {}]   ;;  %s861_s2 = inlined_call_operand.vmem [shape: f32[1,32], index: 2, kind: input, shape index: {}]   ;;  %s862_s3 = inlined_call_operand.vmem [shape: f32[32,192], index: 3, kind: input, shape index: {}]   ;;  %s863_s4 = inlined_call_operand.vmem [shape: f32[1,192], index: 4, kind: input, shape index: {}]   ;;  %s864_s5 = inlined_call_operand.vmem [shape: bf16[256,96], index: 5, kind: output, shape index: {0}]   ;;  %s865_s6 = inlined_call_operand.vmem [shape: bf16[256,96], index: 6, kind: output, shape index: {1}]  }
   0x1 LB: > { %s654_s22 = sadd.s32 4294967295, %s740_s21   ;;  %p658_p0 = scmp.ge.s32.totalorder %s740_s21, 1  ;;  %s740_s21 = sphi %s779_s21, %s17_s21  }
   0x2   : > { %p216_p1 = scmp.lt.s32.totalorder %s740_s21, 9 }
   0x4   : > { %p217_p2 = pnand %p658_p0, %p216_p1 }
   0x5   : > { %v273_v0 = vld [vmem:[%s860_s1] sm:$0xff] (!%p217_p2)  ;;  %v274_v1 = vld [vmem:[%s860_s1 + $0x8] sm:$0xff] (!%p217_p2)  ;;  %s659_s27 = sshll.u32 (!%p217_p2), %s654_s22, 2  ;;  %v387_v4 = vld [vmem:[%s862_s3 + $0x18] sm:$0xff] (!%p217_p2)  ;;  %vm282_vm0 = vcmask (!%p217_p2), 130048   ;;  %v742_v19 = vmov (!%p217_p2), 0.0   ;;  %v394_v33 = vlaneseq (!%p217_p2) }
   0x6   : > { %220 = sbr.rel (%p217_p2) target bundleno = 579 (0x243), region = 40  ;;  %v385_v2 = vld [vmem:[%s862_s3 + $0x8] sm:$0xff] (!%p217_p2)  ;;  %v708_v3 = vpack.c.bf16 (!%p217_p2), %v274_v1, %v273_v0  ;;  %p252_p3 = scmp.lt.s32.totalorder (!%p217_p2), %s659_s27, 31  ;;  %v384_v5 = vld [vmem:[%s862_s3] sm:$0xff] (!%p217_p2)  ;;  %v386_v6 = vld [vmem:[%s862_s3 + $0x10] sm:$0xff] (!%p217_p2)  ;;  %487 = vmatprep.mubr.f32.mxu1 (!%p217_p2), %v742_v19  ;;  %vm404_vm1 = vcmask (!%p217_p2), 261120  }
   0x7   : > { %v712_v7 = vpack.c.bf16 (!%p217_p2), %v387_v4, %v385_v2  ;;  %v714_v8 = vpack.c.bf16 (!%p217_p2), %v386_v6, %v384_v5  ;;  %v389_v13 = vld [vmem:[%s862_s3 + $0x28] sm:$0xff] (!%p217_p2)  ;;  %v391_v14 = vld [vmem:[%s862_s3 + $0x38] sm:$0xff] (!%p217_p2)  ;;  %v388_v16 = vld [vmem:[%s862_s3 + $0x20] sm:$0xff] (!%p217_p2)  ;;  %v395_v34 = vshrl.u32 (!%p217_p2), %v394_v33, 7  ;;  %vm522_vm2 = vcmask (!%p217_p2), 781312   ;;  %s743_s10 = smov (!%p217_p2), 32  }
   0x8   : > { %709 = vmatprep.subr.bf16.mxu0 (!%p217_p2), %v708_v3  ;;  %v716_v15 = vpack.c.bf16 (!%p217_p2), %v391_v14, %v389_v13  ;;  %v390_v17 = vld [vmem:[%s862_s3 + $0x30] sm:$0xff] (!%p217_p2)  ;;  %v665_v20 = vld [vmem:[%s861_s2] ss:$0 sm:$0xff] (!%p217_p2) }
   0x9   : > { %711 = vmatpush3.bf16.msra.mxu0 (!%p217_p2), %v708_v3  ;;  %720 = vmatprep.subr.bf16.mxu1 (!%p217_p2), %v712_v7  ;;  %v718_v18 = vpack.c.bf16 (!%p217_p2), %v390_v17, %v388_v16  ;;  %v396_v35 = vsub.s32 (!%p217_p2), 0, %v395_v34  ;;  %v392_v36 = vld [vmem:[%s863_s4] sm:$0x3] (!%p217_p2)  ;;  %v400_v37 = vsub.s32 (!%p217_p2), 1, %v395_v34 }
   0xa   : > { %713 = vmatprep.subr.bf16.mxu0 (!%p217_p2), %v712_v7  ;;  %722 = vmatpush1.bf16.msra.mxu1 (!%p217_p2), %v714_v8 }
   0xb   : > { %721 = vmatprep.subr.bf16.mxu1 (!%p217_p2), %v716_v15  ;;  %v397_v38 = vrot.slane (!%p217_p2), %v392_v36, %v396_v35  ;;  %v401_v39 = vrot.slane (!%p217_p2), %v392_v36, %v400_v37 }
   0xd   : > { %s867_s27 = smov (!%p252_p3, %s659_s27), 31 }
   0xe   : > { %s660_s12 = sshll.u32 %s867_s27, 3  ;;  %723 = vmatpush1.bf16.msra.mxu1 %v718_v18  ;;  %s662_s30 = sshll.u32 %s867_s27, 2 }
   0xf   : > { %s255_s15 = scalar_lea.vmem %s859_s0, %s660_s12  ;;  %s261_s9 = scalar_lea.vmem %s864_s5, %s662_s30 }
  0x10   : > { %v269_v9 = vld [vmem:[%s255_s15] sm:$0xff]  ;;  %v270_v10 = vld [vmem:[%s255_s15 + $0x8] sm:$0xff]  ;;  %v271_v11 = vld [vmem:[%s255_s15 + $0x10] sm:$0xff]  ;;  %s267_s13 = scalar_lea.vmem %s865_s6, %s662_s30 }
  0x11   : > { %702 = vmatprep.mubr.msk.f32.mxu0 %vm282_vm0, %v269_v9  ;;  %v272_v12 = vld [vmem:[%s255_s15 + $0x18] sm:$0xff] }
  0x12   : > { %703 = vmatmul.mubr.msk.f32.vlgmr.msra.gmra.mrb[0].mxu0 %vm282_vm0, %v270_v10 }
  0x13   : > { %705 = vmatprep.mubr.msk.f32.mxu0 %vm282_vm0, %v271_v11  ;;  %715 = vmatpush1.bf16.msra.mxu0 %v714_v8 }
  0x14   : > { %717 = vmatprep.subr.bf16.mxu0 %v716_v15 }
  0x16   : > { %706 = vmatmul.mubr.msk.f32.gmra.mrb[2].mxu0 %vm282_vm0, %v272_v12 }
  0x17   : > { %719 = vmatpush1.bf16.msra.mxu0 %v718_v18  ;;  %481 = vmatprep.mubr.f32.mxu0 %v742_v19 }
  0xe5   : > { %v704_v21 = vpop.f32.mrb[0].mxu0 }
  0xe6   : > { %v367_v22 = vadd.f32 %v704_v21, %v665_v20  ;;  %v361_v23 = vpop.f32.mrb[1].mxu0 }
  0xe7   : > { %v362_v24 = vadd.f32 %v665_v20, %v361_v23 }
  0xe8   : > { %v381_v25 = vmax.f32 %v367_v22, 0.0 }
  0xe9   : > { %v380_v26 = vmax.f32 %v362_v24, 0.0  ;;  %v707_v27 = vpop.f32.mrb[2].mxu0 }
  0xea   : > { %v371_v28 = vpop.f32.mrb[3].mxu0  ;;  %671 = vmatmul.mubr.msk.f32.vlgmr.msra.gmra.mrb[0].mxu1 %vm404_vm1, %v381_v25  ;;  %v377_v30 = vadd.f32 %v707_v27, %v665_v20 }
  0xeb   : > { %v372_v29 = vadd.f32 %v665_v20, %v371_v28  ;;  %670 = vmatmul.mubr.msk.f32.vlgmr.msra.gmra.mrb[4].mxu0 %vm404_vm1, %v380_v26  ;;  %493 = vmatprep.mubr.f32.mxu1 %v742_v19 }
  0xec   : > { %v383_v32 = vmax.f32 %v377_v30, 0.0 }
  0xed   : > { %v382_v31 = vmax.f32 %v372_v29, 0.0 }
  0xef   : > { %672 = vmatmul.mubr.msk.f32.gmra.mrb[2].mxu1 %vm404_vm1, %v382_v31 }
  0xf0   : > { %499 = vmatprep.mubr.f32.mxu1 %v742_v19 }
  0xf3   : > { %673 = vmatmul.mubr.msk.f32.gmra.mrb[4].mxu1 %vm404_vm1, %v383_v32 }
 0x1bd   : > { %v489_v40 = vpop.f32.mrb[0].mxu1 }
 0x1be   : > { %v490_v41 = vadd.f32 %v489_v40, %v397_v38  ;;  %v483_v42 = vpop.f32.mrb[4].mxu0  ;;  %v491_v43 = vpop.f32.mrb[1].mxu1 }
 0x1bf   : > { %v484_v44 = vadd.f32 %v483_v42, %v397_v38  ;;  %v492_v45 = vadd.f32 %v491_v43, %v401_v39  ;;  %v485_v46 = vpop.f32.mrb[5].mxu0 }
 0x1c0   : > { %v685_v47 = vpack.c.bf16 %v490_v41, %v490_v41  ;;  %v486_v48 = vadd.f32 %v485_v46, %v401_v39 }
 0x1c1   : > { %v684_v49 = vpack.c.bf16 %v484_v44, %v484_v44  ;;  %v689_v50 = vpack.c.bf16 %v492_v45, %v490_v41 }
 0x1c2   : > { %524 = vst.msk [vmem:[%s261_s9 + $0x4] sm:$0xf] %vm522_vm2, %v685_v47  ;;  %v495_v51 = vpop.f32.mrb[2].mxu1  ;;  %v688_v52 = vpack.c.bf16 %v486_v48, %v484_v44 }
 0x1c3   : > { %523 = vst.msk [vmem:[%s261_s9] sm:$0xf] %vm522_vm2, %v684_v49  ;;  %v496_v53 = vadd.f32 %v495_v51, %v397_v38  ;;  %v497_v54 = vpop.f32.mrb[3].mxu1 }
 0x1c4   : > { %v498_v55 = vadd.f32 %v497_v54, %v401_v39  ;;  %539 = vrot.lane.b32.xlu0 %v688_v52, %s743_s10 }
 0x1c5   : > { %v686_v56 = vpack.c.bf16 %v496_v53, %v496_v53 }
 0x1c6   : > { %v501_v57 = vpop.f32.mrb[4].mxu1  ;;  %v690_v58 = vpack.c.bf16 %v498_v55, %v496_v53 }
 0x1c7   : > { %525 = vst.msk [vmem:[%s261_s9 + $0x8] sm:$0xf] %vm522_vm2, %v686_v56  ;;  %v502_v59 = vadd.f32 %v501_v57, %v397_v38  ;;  %v503_v60 = vpop.f32.mrb[5].mxu1 }
 0x1c8   : > { %v504_v61 = vadd.f32 %v503_v60, %v401_v39  ;;  %543 = vrot.lane.b32.xlu1 %v690_v58, %s743_s10  ;;  %541 = vrot.lane.b32.xlu0 %v689_v50, %s743_s10 }
 0x1c9   : > { %v687_v62 = vpack.c.bf16 %v502_v59, %v502_v59 }
 0x1ca   : > { %v691_v63 = vpack.c.bf16 %v504_v61, %v502_v59 }
 0x1cb   : > { %526 = vst.msk [vmem:[%s261_s9 + $0xc] sm:$0xf] %vm522_vm2, %v687_v62 }
 0x1cc   : > { %545 = vrot.lane.b32.xlu1 %v691_v63, %s743_s10 }
 0x236   : > { %v540_v0 = vpop.permute.xlu0 %539 }
 0x237   : > { %v547_v1 = vrot.slane %v540_v0, 4 }
 0x239   : > { %v552_v2 = vsel %vm404_vm1, %v540_v0, %v547_v1 }
 0x23a   : > { %560 = vst.msk [vmem:[%s267_s13] sm:$0xf] %vm522_vm2, %v552_v2  ;;  %v544_v3 = vpop.permute.xlu1 %543  ;;  %v542_v4 = vpop.permute.xlu0 %541 }
 0x23b   : > { %v549_v5 = vrot.slane %v544_v3, 4  ;;  %v548_v6 = vrot.slane %v542_v4, 4 }
 0x23d   : > { %v554_v7 = vsel %vm404_vm1, %v544_v3, %v549_v5  ;;  %v553_v8 = vsel %vm404_vm1, %v542_v4, %v548_v6 }
 0x23e   : > { %562 = vst.msk [vmem:[%s267_s13 + $0x8] sm:$0xf] %vm522_vm2, %v554_v7  ;;  %561 = vst.msk [vmem:[%s267_s13 + $0x4] sm:$0xf] %vm522_vm2, %v553_v8  ;;  %v546_v9 = vpop.permute.xlu1 %545 }
 0x23f   : > { %v550_v10 = vrot.slane %v546_v9, 4 }
 0x241   : > { %v555_v11 = vsel %vm404_vm1, %v546_v9, %v550_v10 }
 0x242   : > { %563 = vst.msk [vmem:[%s267_s13 + $0xc] sm:$0xf] %vm522_vm2, %v555_v11 }
 0x243 PF: > { %s17_s21 = sadd.s32 1, %s740_s21  }
 0x244   : > { %p14_p4 = scmp.ge.s32.totalorder %s17_s21, 10  }
 0x246   :  { %16 = sbr.rel (!%p14_p4) target bundleno = 1 (0x1), region = 82 }

</bundles_post_ra>
